<compile_context>
chip_gen: v7x
topology: tpu7x:2x2x1
jax: 0.10.0
libtpu: 0.0.40
codegen_flags: <defaults>
</compile_context>

<pallas_src>
import functools

import jax
import jax.numpy as jnp
from jax import lax
from jax.experimental import pallas as pl


def _round_up(x: int, m: int) -> int:
    return ((x + m - 1) // m) * m


# -----------------------------------------------------------------------------
# Pallas kernel: fused GraphConv._linear_transform for the whole batch
#   out = relu( f0_rows @ W  +  s_rows )
# where rows = B * n_pad (batch collapsed into the sublane dim) and s_rows is
# the per-batch f1@bias row pre-broadcast in the wrapper.
# -----------------------------------------------------------------------------
def _graphconv_linear_kernel(f0_ref, w_ref, s_ref, out_ref):
    # f0_ref: (R, OF_pad) bf16   w_ref: (OF_pad, IF_pad) bf16
    # s_ref : (R, IF_pad) f32    out_ref: (R, IF_pad) f32,  R = B * n_pad
    z = jnp.dot(f0_ref[...], w_ref[...], preferred_element_type=jnp.float32)
    out_ref[...] = jnp.maximum(z + s_ref[...], 0.0)


def graphconv_linear_transform_batched(feat0, feat1, weight_padded, bias, in_features):
    """feat0, feat1: (B, N, OF) f32; weight_padded: (OF_pad, IF_pad) bf16
    (pre-padded, pre-cast); bias: (OF,) f32 -> (B, N, IF) f32."""
    bsz, n, of = feat0.shape
    of_p, if_p = weight_padded.shape
    assert in_features == n, (
        "torch last-axis broadcast in _linear_transform requires in_features == N")

    n_p = _round_up(max(n, 8), 8)      # sublane-align each batch's row block
    rows = bsz * n_p                   # batch collapsed into the sublane dim

    # features[1] = f1 @ bias, computed in the wrapper (tiny exact-f32 matvec)
    # so f1 never becomes a (zero-padded) kernel operand.
    s = jnp.einsum('bno,o->bn', feat1, bias,
                   precision=lax.Precision.HIGHEST)                 # (B, N)
    s_pad = jnp.pad(s, ((0, 0), (0, if_p - n)))                     # (B, IF_pad)
    # torch broadcast of the (N,)==(IF,) result along the LAST axis, materialized
    # per batch row block (~8 KiB).
    s_rows = jnp.broadcast_to(s_pad[:, None, :], (bsz, n_p, if_p)).reshape(rows, if_p)

    # lane-dense, bf16 MXU operand (zero padding contributes exactly 0).
    f0_rows = jnp.pad(feat0, ((0, 0), (0, n_p - n), (0, of_p - of))
                      ).reshape(rows, of_p).astype(jnp.bfloat16)

    out = pl.pallas_call(
        _graphconv_linear_kernel,
        out_shape=jax.ShapeDtypeStruct((rows, if_p), jnp.float32),
        grid=(1,),
        in_specs=[
            pl.BlockSpec((rows, of_p), lambda i: (0, 0)),
            pl.BlockSpec((of_p, if_p), lambda i: (0, 0)),
            pl.BlockSpec((rows, if_p), lambda i: (0, 0)),
        ],
        out_specs=pl.BlockSpec((rows, if_p), lambda i: (0, 0)),
    )(f0_rows, weight_padded, s_rows)
    return out.reshape(bsz, n_p, if_p)[:, :n, :in_features]


# -----------------------------------------------------------------------------
# Whole batched forward (gathers + kernel + candidate path) under ONE jax.jit.
# -----------------------------------------------------------------------------
@functools.partial(jax.jit, static_argnames=("in_features",))
def _graph_model_forward(inputs_bn, graph, embedding, weight_padded, bias, *, in_features):
    # GraphAggregator stand-in: neighbor-mean over an embedding table.
    # TODO(synk): real GraphAggregator (k_hop recursion), BehaviorAggregator and
    # the pickled graph are undefined in the source; deterministic synthetic
    # stand-ins are used for the glue around the Pallas hot path.
    neigh = graph[inputs_bn]                              # (B, N, K)
    feat0 = jnp.mean(embedding[neigh], axis=2)            # (B, N, E)  aggregator(graph, nodes)
    feat1 = embedding[inputs_bn]                          # (B, N, E)  get_embedding(nodes)
    feats = graphconv_linear_transform_batched(
        feat0, feat1, weight_padded, bias, in_features)   # (B, N, IF)

    # candidate path: candidate_select on each input's last node, then aggregate.
    cand_ids = graph[inputs_bn[:, -1]]                    # (B, K)
    cand_neigh = graph[cand_ids]                          # (B, K, K)
    cand_feats = jnp.mean(embedding[cand_neigh], axis=2)  # (B, K, E)
    return feats, cand_feats


class GraphModel:
    """Batched JAX/Pallas port of the PyTorch GraphModel forward pass."""

    def __init__(self, k_hop, graph, num_embed, embed_size,
                 in_features, out_features, key):
        k_emb, k_w, k_b = jax.random.split(key, 3)
        self.k_hop = k_hop
        self.graph = graph                                  # (num_embed, K) neighbor table
        self.in_features = in_features
        self.embedding = jax.random.normal(k_emb, (num_embed, embed_size), jnp.float32)
        self.weight = jax.random.normal(k_w, (out_features, in_features), jnp.float32)
        self.bias = jax.random.normal(k_b, (out_features,), jnp.float32)
        # Constant-operand prep hoisted out of the per-call path: pad W once to
        # a lane-dense (OF_pad, IF_pad) tile and cast to bf16 for the MXU.
        of_p = _round_up(out_features, 128)
        if_p = _round_up(in_features, 128)
        self.weight_padded = jnp.pad(
            self.weight,
            ((0, of_p - out_features), (0, if_p - in_features))).astype(jnp.bfloat16)

    def __call__(self, inputs):
        # Batch the original per-input Python loop into one jitted call with a
        # single pallas_call.
        inputs_bn = jnp.stack([jnp.asarray(x, jnp.int32) for x in inputs], axis=0)
        feats, cand_feats = _graph_model_forward(
            inputs_bn, self.graph, self.embedding, self.weight_padded, self.bias,
            in_features=self.in_features)
        # BehaviorAggregator(input_size=None, hidden_size=None) stand-in: identity.
        return [(feats[i], cand_feats[i]) for i in range(len(inputs))]


# -----------------------------------------------------------------------------
# Driver
# -----------------------------------------------------------------------------
if __name__ == "__main__":
    key = jax.random.PRNGKey(0)
    k_params, k_graph, k_in0, k_in1 = jax.random.split(key, 4)

    B = 2                 # number of input sequences (batched into one kernel call)
    N = 8                 # nodes per input sequence
    IN_FEATURES = 8       # == N (required by the torch last-axis broadcast)
    OUT_FEATURES = 32     # == embed_size
    NUM_EMBED = 64
    K_NEIGHBORS = 4
    K_HOP = 2

    # deterministic synthetic neighbor table (stands in for the pickled graph)
    graph = jax.random.randint(k_graph, (NUM_EMBED, K_NEIGHBORS), 0, NUM_EMBED,
                               dtype=jnp.int32)

    model = GraphModel(k_hop=K_HOP, graph=graph, num_embed=NUM_EMBED,
                       embed_size=OUT_FEATURES, in_features=IN_FEATURES,
                       out_features=OUT_FEATURES, key=k_params)

    inputs = [
        jax.random.randint(k_in0, (N,), 0, NUM_EMBED, dtype=jnp.int32),
        jax.random.randint(k_in1, (N,), 0, NUM_EMBED, dtype=jnp.int32),
    ]

    outputs = model(inputs)
    for feats, cand_feats in outputs:
        jax.block_until_ready(feats)
        jax.block_until_ready(cand_feats)

    # correctness spot-check of the Pallas hot path vs. plain JAX references
    for b_idx, x in enumerate(inputs):
        f0 = jnp.mean(model.embedding[graph[x]], axis=1)          # (N, OF)
        f1 = model.embedding[x]                                   # (N, OF)
        s = jnp.dot(f1, model.bias, precision=lax.Precision.HIGHEST)

        # (a) reference matching the kernel's arithmetic exactly: bf16-rounded
        #     MXU operands, f32 accumulation -> tight tolerance.
        z_bf16 = jnp.dot(f0.astype(jnp.bfloat16).astype(jnp.float32),
                         model.weight.astype(jnp.bfloat16).astype(jnp.float32),
                         precision=lax.Precision.HIGHEST)
        ref_kernel = jnp.maximum(z_bf16 + s[None, :], 0.0)

        # (b) full-f32 (torch) reference; looser tolerance accounts for the
        #     deliberate bf16 cast of the MXU operands (perf review item 5).
        z_f32 = jnp.dot(f0, model.weight, precision=lax.Precision.HIGHEST)
        ref_f32 = jnp.maximum(z_f32 + s[None, :], 0.0)

        ref_cand = jnp.mean(model.embedding[graph[graph[x[-1]]]], axis=1)

        got_feats, got_cand = outputs[b_idx]
        got_feats = jax.block_until_ready(got_feats)
        got_cand = jax.block_until_ready(got_cand)
        assert jnp.allclose(got_feats, ref_kernel, atol=1e-3, rtol=1e-3), \
            "feature mismatch (bf16-operand reference)"
        assert jnp.allclose(got_feats, ref_f32, atol=5e-2, rtol=5e-2), \
            "feature mismatch (f32 reference)"
        assert jnp.allclose(got_cand, ref_cand, atol=1e-3, rtol=1e-3), \
            "candidate mismatch"

    print("KERNEL_OK")
</pallas_src>

<mosaic_0001>
module attributes {stable_mosaic.version = 11 : i64} {
  func.func @_graphconv_linear_kernel(%arg0: i32, %arg1: memref<16x128xbf16, #tpu.memory_space<vmem>>, %arg2: memref<128x128xbf16, #tpu.memory_space<vmem>>, %arg3: memref<16x128xf32, #tpu.memory_space<vmem>>, %arg4: memref<16x128xf32, #tpu.memory_space<vmem>>) attributes {dimension_semantics = [#tpu.dimension_semantics<arbitrary>], iteration_bounds = array<i64: 1>, scalar_prefetch = 0 : i64, scratch_operands = 0 : i64, tpu.core_type = #tpu.core_type<tc>, window_params = [{pipeline_mode = #tpu.pipeline_mode<synchronous>, transform_indices = @transform_0, window_bounds = array<i64: 16, 128>}, {pipeline_mode = #tpu.pipeline_mode<synchronous>, transform_indices = @transform_1, window_bounds = array<i64: 128, 128>}, {pipeline_mode = #tpu.pipeline_mode<synchronous>, transform_indices = @transform_2, window_bounds = array<i64: 16, 128>}, {pipeline_mode = #tpu.pipeline_mode<synchronous>, transform_indices = @transform_3, window_bounds = array<i64: 16, 128>}]} {
    %c0 = arith.constant 0 : index
    %c0_0 = arith.constant 0 : index
    %0 = vector.load %arg1[%c0, %c0_0] : memref<16x128xbf16, #tpu.memory_space<vmem>>, vector<16x128xbf16>
    %c0_1 = arith.constant 0 : index
    %c0_2 = arith.constant 0 : index
    %1 = vector.load %arg2[%c0_1, %c0_2] : memref<128x128xbf16, #tpu.memory_space<vmem>>, vector<128x128xbf16>
    %cst = arith.constant dense<0.000000e+00> : vector<16x128xf32>
    %2 = tpu.matmul %0, %1, %cst {dimension_numbers = #tpu.dot_dimension_numbers<[1], [0], [0], [1], [0, 0, 1, 1], [], []>} : vector<16x128xbf16>, vector<128x128xbf16>, vector<16x128xf32> -> vector<16x128xf32>
    %c0_3 = arith.constant 0 : index
    %c0_4 = arith.constant 0 : index
    %3 = vector.load %arg3[%c0_3, %c0_4] : memref<16x128xf32, #tpu.memory_space<vmem>>, vector<16x128xf32>
    %4 = arith.addf %2, %3 : vector<16x128xf32>
    %cst_5 = arith.constant 0.000000e+00 : f32
    %5 = vector.broadcast %cst_5 : f32 to vector<16x128xf32>
    %6 = arith.maximumf %4, %5 : vector<16x128xf32>
    %c0_6 = arith.constant 0 : index
    %c0_7 = arith.constant 0 : index
    %7 = vector.load %arg4[%c0_6, %c0_7] : memref<16x128xf32, #tpu.memory_space<vmem>>, vector<16x128xf32>
    tpu.vector_store %arg4[%c0_6, %c0_7], %6 {strides = array<i32>} : memref<16x128xf32, #tpu.memory_space<vmem>>, vector<16x128xf32>,
    return
  }
  func.func @transform_0(%arg0: i32) -> (i32, i32) {
    %c0_i32 = arith.constant 0 : i32
    %c0_i32_0 = arith.constant 0 : i32
    %c0_i32_1 = arith.constant 0 : i32
    return %c0_i32, %c0_i32_0 : i32, i32
  }
  func.func @transform_1(%arg0: i32) -> (i32, i32) {
    %c0_i32 = arith.constant 0 : i32
    %c0_i32_0 = arith.constant 0 : i32
    %c0_i32_1 = arith.constant 0 : i32
    return %c0_i32, %c0_i32_0 : i32, i32
  }
  func.func @transform_2(%arg0: i32) -> (i32, i32) {
    %c0_i32 = arith.constant 0 : i32
    %c0_i32_0 = arith.constant 0 : i32
    %c0_i32_1 = arith.constant 0 : i32
    return %c0_i32, %c0_i32_0 : i32, i32
  }
  func.func @transform_3(%arg0: i32) -> (i32, i32) {
    %c0_i32 = arith.constant 0 : i32
    %c0_i32_0 = arith.constant 0 : i32
    %c0_i32_1 = arith.constant 0 : i32
    return %c0_i32, %c0_i32_0 : i32, i32
  }
}

</mosaic_0001>

<bundles_post_ra>
// kernel: _graph_model_forward.1
= control target key start
LH: loop header
LB: loop body
LE: loop exit
PB: predicated region body
PF: predicated region fallthrough
CT: control target
= control target key end

     0   :  { %v227_v1 = vmov 0.0   ;;  %vm228_vm0 = vmmov 0   ;;  %s297_s0 = inlined_call_operand.vmem [shape: bf16[16,128], index: 0, kind: input, shape index: {}]   ;;  %s298_s1 = inlined_call_operand.vmem [shape: bf16[128,128], index: 1, kind: input, shape index: {}]   ;;  %s299_s2 = inlined_call_operand.vmem [shape: f32[16,128], index: 2, kind: input, shape index: {}]   ;;  %s300_s3 = inlined_call_operand.hbm [shape: f32[16,128], index: 3, kind: output, shape index: {}]  }
   0x1   :  { %v194_v0 = vld [vmem:[%s298_s1] sm:$0xff]   ;;  %169 = vmatprep.subr.bf16.mxu0 %v227_v1  ;;  %v195_v2 = vld [vmem:[%s298_s1 + $0x8] sm:$0xff]   ;;  %185 = vmatprep.mubr.msk.bf16.mxu0 %vm228_vm0, %v227_v1  ;;  %v196_v3 = vld [vmem:[%s298_s1 + $0x10] sm:$0xff]  }
   0x2   :  { %170 = vmatpush3.bf16.msra.mxu0 %v194_v0 }
   0x3   :  { %171 = vmatprep.subr.bf16.mxu0 %v227_v1 }
   0x6   :  { %172 = vmatpush3.bf16.msra.mxu0 %v195_v2 }
   0x7   :  { %173 = vmatprep.subr.bf16.mxu0 %v227_v1 }
   0x8   :  { %8 = vsyncpa [#allocation3], 0  ;;  %v197_v4 = vld [vmem:[%s298_s1 + $0x18] sm:$0xff]   ;;  %v198_v5 = vld [vmem:[%s298_s1 + $0x20] sm:$0xff]   ;;  %s229_s7 = smov [#allocation2]  }
   0x9   :  { %v199_v6 = vld [vmem:[%s298_s1 + $0x28] sm:$0xff]   ;;  %v200_v7 = vld [vmem:[%s298_s1 + $0x30] sm:$0xff]   ;;  %v201_v8 = vld [vmem:[%s298_s1 + $0x38] sm:$0xff]   ;;  %s140_s1 = sshll.u32 %s229_s7, 4  ;;  %s141_s1 = int_to_ptr.vmem [resolvable:$true] %s140_s1 }
   0xa   :  { %174 = vmatpush3.bf16.msra.mxu0 %v196_v3  ;;  %v202_v9 = vld [vmem:[%s297_s0] sm:$0xff]   ;;  %v35_v12 = vld [vmem:[%s299_s2 + $0x8] sm:$0xff]  ;;  %s203_s0 = scalar_lea.vmem %s141_s1, 256  ;;  %p208_p1 = scmp.lt.s32.totalorder %s141_s1, %s141_s1 }
   0xb   :  { %175 = vmatprep.subr.bf16.mxu0 %v227_v1  ;;  %v34_v10 = vld [vmem:[%s299_s2] sm:$0xff]  ;;  %p204_p0 = scmp.ne.s32.totalorder %s141_s1, %s203_s0  ;;  %p209_p2 = scmp.lt.s32.totalorder %s203_s0, %s203_s0 }
   0xd   :  { %p210_p3 = por %p209_p2, %p208_p1 }
   0xe   :  { %176 = vmatpush3.bf16.msra.mxu0 %v197_v4 }
   0xf   :  { %177 = vmatprep.subr.bf16.mxu0 %v227_v1  ;;  %p211_p4 = pnand %p210_p3, %p204_p0 }
  0x12   :  { %178 = vmatpush3.bf16.msra.mxu0 %v198_v5 }
  0x13   :  { %179 = vmatprep.subr.bf16.mxu0 %v227_v1 }
  0x16   :  { %180 = vmatpush3.bf16.msra.mxu0 %v199_v6 }
  0x17   :  { %181 = vmatprep.subr.bf16.mxu0 %v227_v1 }
  0x1a   :  { %182 = vmatpush3.bf16.msra.mxu0 %v200_v7 }
  0x1b   :  { %183 = vmatprep.subr.bf16.mxu0 %v227_v1 }
  0x1e   :  { %184 = vmatpush3.bf16.msra.mxu0 %v201_v8 }
  0x21   :  { %186 = vmatmul.mubr.bf16.vlgmr.msra.gmra.mrb[0].mxu0 %v202_v9 }
  0xf4   :  { %v124_v11 = vpop.f32.mrb[0].mxu0 }
  0xf5   :  { %v125_v13 = vadd.f32 %v124_v11, %v34_v10  ;;  %v187_v14 = vpop.f32.mrb[1].mxu0 }
  0xf6   :  { %v127_v15 = vpop.f32.mrb[2].mxu0 }
  0xf7   :  { %v131_v16 = vmax.f32 %v125_v13, 0.0  ;;  %v128_v17 = vadd.f32 %v127_v15, %v35_v12  ;;  %v188_v18 = vpop.f32.mrb[3].mxu0 }
  0xf9   :  { %133 = vst [vmem:[#allocation2] sm:$0xff] %v131_v16  ;;  %v132_v19 = vmax.f32 %v128_v17, 0.0 }
  0xfb   :  { %134 = vst [vmem:[#allocation2 + $0x8] sm:$0xff] %v132_v19 }
  0xfc   :  { %214 = shalt.err (!%p211_p4)
}
  0xfd   :  { %s215_s9 = scalar_lea.hbm %s300_s3, 256 }
  0xfe   :  { %p216_p5 = scmp.ne.s32.totalorder %s300_s3, %s215_s9  ;;  %p219_p6 = scmp.lt.u32.totalorder %s215_s9, %s300_s3 }
 0x100   :  { %p221_p7 = pnand %p219_p6, %p216_p5 }
 0x102   :  { %224 = shalt.err (!%p221_p7)
}
 0x103   :  { %s230_s14 = smov 128   ;;  %s231_s15 = smov 8  }
 0x104   :  { %146 = dma.vmem_to_hbm [thread:$0]  %s141_s1, 256, %s300_s3, [#allocation3], %s230_s14, %s230_s14, %s231_s15  }
 0x105   :  { %225 = dma.done.wait [#allocation3], 256  }
 0x106   :  { %226 = vsyncadd [#allocation3], 4294967040 }
 0x107   :  { %150 = vsyncpa [#allocation3], 1 }

</bundles_post_ra>
